<compile_context>
chip_gen: v7x
topology: tpu7x:2x2x1
jax: 0.10.0
libtpu: 0.0.40
codegen_flags: <defaults>
</compile_context>

<pallas_src>
import jax
import jax.numpy as jnp
from jax.experimental import pallas as pl
from jax.experimental.pallas import tpu as pltpu


_LANES = 128
_MAX_TILE_ROWS = 2048                      # (2048,128) f32 = 1 MiB per block
_FUSED_MAX_BYTES = 2 * 1024 * 1024         # fused single-block path cutoff
_VMEM_LIMIT = 32 * 1024 * 1024             # explicit, safe on v5e/v6e/v7x


# --------------------------------------------------------------------------
# Fused path (small/medium tensors): one kernel, whole slab resident in VMEM.
# --------------------------------------------------------------------------
def _fused_softmax_kernel(x_ref, o_ref):
    ex = jnp.exp(x_ref[...].astype(jnp.float32))      # exp always in f32
    total = jnp.sum(ex, keepdims=True)                # (1, 1) global sum
    inv = pl.reciprocal(total, approx=False)          # exact
    o_ref[...] = (ex * inv).astype(o_ref.dtype)


# --------------------------------------------------------------------------
# Two-pass path, phase 1: per-tile partial sums of exp(x)  (fully parallel).
# --------------------------------------------------------------------------
def _make_partial_sumexp_kernel(rows: int, tile_rows: int):
    ragged = (rows % tile_rows) != 0

    def kernel(x_ref, p_ref):
        ex = jnp.exp(x_ref[...].astype(jnp.float32))
        if ragged:
            # mask rows of the last (partial) tile that lie past the array end
            tile_start = pl.program_id(0) * tile_rows
            row_idx = tile_start + jax.lax.broadcasted_iota(
                jnp.int32, ex.shape, 0)
            ex = jnp.where(row_idx < rows, ex, 0.0)
        p_ref[...] = jnp.sum(ex, axis=0, keepdims=True)   # (1, 128) partial

    return kernel


# --------------------------------------------------------------------------
# Two-pass path, phase 2: out = exp(x) * inv_sum  (inv_sum lives in SMEM).
# --------------------------------------------------------------------------
def _normalize_kernel(inv_ref, x_ref, o_ref):
    inv = inv_ref[0]                                   # f32 scalar from SMEM
    ex = jnp.exp(x_ref[...].astype(jnp.float32))
    o_ref[...] = (ex * inv).astype(o_ref.dtype)


def global_softmax(x: jax.Array) -> jax.Array:
    """exp(x) / sum(exp(x)) with the sum taken over every element of x."""
    orig_shape = x.shape
    dtype = x.dtype
    n = x.size

    # ---- layout: lane-dense (rows, 128) slab ------------------------------
    # Pad only to the next multiple of 128 elements (with -inf, so exp()==0).
    # When n % 128 == 0 this is a pure reshape: no extra HBM pass in or out.
    rows = -(-n // _LANES)
    padded_n = rows * _LANES
    flat = x.reshape(-1)
    if padded_n != n:
        pad = jnp.full((padded_n - n,), -jnp.inf, dtype=dtype)
        flat = jnp.concatenate([flat, pad])
    x2d = flat.reshape(rows, _LANES)

    in_bytes = padded_n * x.dtype.itemsize

    if in_bytes <= _FUSED_MAX_BYTES:
        # ---- fused single-kernel path (2N HBM traffic, one launch) --------
        out2d = pl.pallas_call(
            _fused_softmax_kernel,
            out_shape=jax.ShapeDtypeStruct((rows, _LANES), dtype),
            compiler_params=pltpu.CompilerParams(
                vmem_limit_bytes=_VMEM_LIMIT),
        )(x2d)
    else:
        # ---- two-pass tiled path ------------------------------------------
        tile_rows = min(_MAX_TILE_ROWS, rows)      # multiple of 8 here
        num_tiles = -(-rows // tile_rows)          # >= 2 by construction
        x_spec = pl.BlockSpec((tile_rows, _LANES), lambda i: (i, 0))

        # phase 1: independent per-tile partial sums (megacore-shardable)
        partials = pl.pallas_call(
            _make_partial_sumexp_kernel(rows, tile_rows),
            out_shape=jax.ShapeDtypeStruct((num_tiles, _LANES), jnp.float32),
            grid=(num_tiles,),
            in_specs=[x_spec],
            out_specs=pl.BlockSpec((1, _LANES), lambda i: (i, 0)),
            compiler_params=pltpu.CompilerParams(
                dimension_semantics=("parallel",),
                vmem_limit_bytes=_VMEM_LIMIT),
        )(x2d)

        # tiny final collapse + reciprocal (num_tiles x 128 f32) in XLA
        inv_sum = (1.0 / jnp.sum(partials)).reshape((1,)).astype(jnp.float32)

        # phase 2: reciprocal-multiply normalize; inv_sum via SMEM scalar path
        out2d = pl.pallas_call(
            _normalize_kernel,
            out_shape=jax.ShapeDtypeStruct((rows, _LANES), dtype),
            grid=(num_tiles,),
            in_specs=[pl.BlockSpec(memory_space=pltpu.MemorySpace.SMEM),
                      x_spec],
            out_specs=x_spec,
            compiler_params=pltpu.CompilerParams(
                dimension_semantics=("parallel",),
                vmem_limit_bytes=_VMEM_LIMIT),
        )(inv_sum, x2d)

    out_flat = out2d.reshape(-1)
    if padded_n != n:
        out_flat = out_flat[:n]
    return out_flat.reshape(orig_shape)


if __name__ == "__main__":
    key = jax.random.PRNGKey(0)

    # small shape consistent with the module's forward (any tensor works)
    x = jax.random.normal(key, (2, 4, 16, 16), dtype=jnp.float32)
    out = jax.block_until_ready(global_softmax(x))
    ref = jnp.exp(x) / jnp.sum(jnp.exp(x))
    assert out.shape == x.shape
    assert out.dtype == x.dtype
    assert jnp.allclose(out, ref, atol=1e-6, rtol=1e-5)
    assert jnp.allclose(jnp.sum(out), 1.0, atol=1e-5)

    # element count NOT a multiple of 128 (exercises the -inf padded tail)
    x2 = jax.random.normal(jax.random.PRNGKey(0), (3, 5, 7), dtype=jnp.float32)
    out2 = jax.block_until_ready(global_softmax(x2))
    ref2 = jnp.exp(x2) / jnp.sum(jnp.exp(x2))
    assert jnp.allclose(out2, ref2, atol=1e-6, rtol=1e-5)
    assert jnp.allclose(jnp.sum(out2), 1.0, atol=1e-5)

    # larger tensor: exercises the tiled two-pass path + ragged last row-tile
    x3 = jax.random.normal(jax.random.PRNGKey(0), (1024, 640), dtype=jnp.float32)
    out3 = jax.block_until_ready(global_softmax(x3))
    ref3 = jnp.exp(x3) / jnp.sum(jnp.exp(x3))
    assert jnp.allclose(out3, ref3, rtol=1e-3, atol=1e-12)
    assert jnp.allclose(jnp.sum(out3), 1.0, atol=1e-4)

    print("KERNEL_OK")
</pallas_src>

<mosaic_0001>
module attributes {stable_mosaic.version = 11 : i64} {
  func.func @_fused_softmax_kernel(%arg0: memref<16x128xf32, #tpu.memory_space<vmem>>, %arg1: memref<16x128xf32, #tpu.memory_space<vmem>>) attributes {dimension_semantics = [], scalar_prefetch = 0 : i64, scratch_operands = 0 : i64, tpu.core_type = #tpu.core_type<tc>} {
    %c0 = arith.constant 0 : index
    %c0_0 = arith.constant 0 : index
    %0 = vector.load %arg0[%c0, %c0_0] : memref<16x128xf32, #tpu.memory_space<vmem>>, vector<16x128xf32>
    %1 = math.exp %0 : vector<16x128xf32>
    %2 = vector.shape_cast %1 : vector<16x128xf32> to vector<1x16x128xf32>
    %cst = arith.constant dense<0.000000e+00> : vector<1xf32>
    %3 = vector.multi_reduction <add>, %2, %cst [1, 2] : vector<1x16x128xf32> to vector<1xf32>
    %4 = vector.shape_cast %3 : vector<1xf32> to vector<1x1x1xf32>
    %5 = vector.extract %4[0, 0, 0] : f32 from vector<1x1x1xf32>
    %6 = vector.broadcast %5 : f32 to vector<1x1xf32>
    %7 = tpu.reciprocal %6 : vector<1x1xf32> -> vector<1x1xf32>
    %8 = vector.broadcast %7 : vector<1x1xf32> to vector<16x128xf32>
    %9 = arith.mulf %1, %8 : vector<16x128xf32>
    %c0_1 = arith.constant 0 : index
    %c0_2 = arith.constant 0 : index
    %10 = vector.load %arg1[%c0_1, %c0_2] : memref<16x128xf32, #tpu.memory_space<vmem>>, vector<16x128xf32>
    tpu.vector_store %arg1[%c0_1, %c0_2], %9 {strides = array<i32>} : memref<16x128xf32, #tpu.memory_space<vmem>>, vector<16x128xf32>,
    return
  }
}

</mosaic_0001>

<bundles_post_ra>
// kernel: tpu_custom_call.1
= control target key start
LH: loop header
LB: loop body
LE: loop exit
PB: predicated region body
PF: predicated region fallthrough
CT: control target
= control target key end

     0   :  { %6 = vsyncpa [#allocation3], 0  ;;  %s166_s0 = inlined_call_operand.hbm [shape: f32[16,128], index: 0, kind: input, shape index: {}]   ;;  %s167_s1 = inlined_call_operand.hbm [shape: f32[16,128], index: 1, kind: output, shape index: {}]  }
   0x1   :  { %7 = vsyncpa [#allocation4], 0  ;;  %s122_s6 = smov [#allocation2]   ;;  %s74_s10 = scalar_lea.hbm %s166_s0, 256 }
   0x2   :  { %s13_s7 = sshll.u32 %s122_s6, 4  ;;  %p75_p0 = scmp.ne.s32.totalorder %s166_s0, %s74_s10  ;;  %s14_s7 = int_to_ptr.vmem [resolvable:$true] %s13_s7 }
   0x3   :  { %p78_p1 = scmp.lt.u32.totalorder %s74_s10, %s166_s0 }
   0x5   :  { %p80_p2 = pnand %p78_p1, %p75_p0 }
   0x7   :  { %83 = shalt.err (!%p80_p2)
}
   0x8   :  { %s84_s15 = scalar_lea.vmem %s14_s7, 256  ;;  %p89_p4 = scmp.lt.s32.totalorder %s14_s7, %s14_s7 }
   0x9   :  { %p85_p3 = scmp.ne.s32.totalorder %s14_s7, %s84_s15  ;;  %p90_p5 = scmp.lt.s32.totalorder %s84_s15, %s84_s15 }
   0xb   :  { %p91_p6 = por %p90_p5, %p89_p4 }
   0xd   :  { %p92_p7 = pnand %p91_p6, %p85_p3 }
   0xf   :  { %95 = shalt.err (!%p92_p7)
}
  0x10   :  { %s123_s16 = smov 128   ;;  %s124_s17 = smov 8  }
  0x11   :  { %19 = dma.hbm_to_vmem [thread:$0]  %s166_s0, 256, %s14_s7, [#allocation3], %s123_s16, %s123_s16, %s124_s17  }
  0x12   :  { %118 = dma.done.wait [#allocation3], 256  }
  0x13   :  { %119 = vsyncadd [#allocation3], 4294967040  ;;  %v23_v0 = vld [vmem:[#allocation2] sm:$0xff]  ;;  %v24_v1 = vld [vmem:[#allocation2 + $0x8] sm:$0xff]  ;;  %s125_s20 = smov [#allocation5]  }
  0x14   :  { %v25_v2 = vmul.f32 1.442695, %v23_v0  ;;  %v27_v3 = vmul.f32 1.442695, %v24_v1  ;;  %s50_s21 = sshll.u32 %s125_s20, 4  ;;  %s51_s21 = int_to_ptr.vmem [resolvable:$true] %s50_s21 }
  0x15   :  { %s96_s22 = scalar_lea.vmem %s51_s21, 256  ;;  %p101_p9 = scmp.lt.s32.totalorder %s51_s21, %s51_s21 }
  0x16   :  { %68 = vpow2.f32 %v25_v2  ;;  %p97_p8 = scmp.ne.s32.totalorder %s51_s21, %s96_s22  ;;  %p102_p10 = scmp.lt.s32.totalorder %s96_s22, %s96_s22 }
  0x17   :  { %70 = vpow2.f32 %v27_v3 }
  0x18   :  { %p103_p11 = por %p102_p10, %p101_p9 }
  0x1a   :  { %p104_p12 = pnand %p103_p11, %p97_p8 }
  0x20   :  { %v69_v4 = vpop.eup %68 }
  0x21   :  { %v71_v5 = vpop.eup %70 }
  0x22   :  { %v29_v6 = vadd.f32 %v71_v5, %v69_v4 }
  0x24   :  { %30 = vadd.xlane.f32.xlu0 %v29_v6 }
  0xb1   :  { %v31_v7 = vpop.xlane.xlu0 %30 }
  0xb2   :  { %v32_v8 = vrot.slane %v31_v7, 4 }
  0xb4   :  { %v33_v9 = vadd.f32 %v32_v8, %v31_v7 }
  0xb6   :  { %v34_v10 = vrot.slane %v33_v9, 2 }
  0xb8   :  { %v35_v11 = vadd.f32 %v34_v10, %v33_v9 }
  0xba   :  { %v36_v12 = vrot.slane %v35_v11, 1 }
  0xbc   :  { %v37_v13 = vadd.f32 %v36_v12, %v35_v11 }
  0xbe   :  { %62 = vpush %v37_v13 }
  0xef   :  { %s63_s0 = spop %62 }
  0xf0   :  { %v39_v14 = vstv %s63_s0 }
  0xf1   :  { %72 = vrcp.f32 %v39_v14 }
  0xfb   :  { %v73_v15 = vpop.eup %72 }
  0xfc   :  { %v41_v16 = vmul.f32 %v73_v15, %v69_v4  ;;  %v42_v17 = vmul.f32 %v73_v15, %v71_v5 }
  0xfe   :  { %43 = vst [vmem:[#allocation5] sm:$0xff] %v41_v16  ;;  %44 = vst [vmem:[#allocation5 + $0x8] sm:$0xff] %v42_v17 }
  0xff   :  { %107 = shalt.err (!%p104_p12)
}
 0x100   :  { %s108_s25 = scalar_lea.hbm %s167_s1, 256 }
 0x101   :  { %p109_p13 = scmp.ne.s32.totalorder %s167_s1, %s108_s25  ;;  %p112_p0 = scmp.lt.u32.totalorder %s108_s25, %s167_s1 }
 0x103   :  { %p114_p1 = pnand %p112_p0, %p109_p13 }
 0x105   :  { %117 = shalt.err (!%p114_p1)
}
 0x106   :  { %56 = dma.vmem_to_hbm [thread:$0]  %s51_s21, 256, %s167_s1, [#allocation4], %s123_s16, %s123_s16, %s124_s17  }
 0x107   :  { %120 = dma.done.wait [#allocation4], 256  }
 0x108   :  { %121 = vsyncadd [#allocation4], 4294967040 }
 0x109   :  { %60 = vsyncpa [#allocation3], 1 }
 0x10a   :  { %61 = vsyncpa [#allocation4], 1 }

</bundles_post_ra>
